<compile_context>
chip_gen: v7x
topology: tpu7x:2x2x1
jax: 0.10.0
libtpu: 0.0.40
codegen_flags: <defaults>
</compile_context>

<pallas_src>
import functools

import numpy as np

import jax
import jax.numpy as jnp
from jax.experimental import pallas as pl
from jax.experimental.pallas import tpu as pltpu


# ----------------------------- Pallas kernel -------------------------------


def _transition_fused_kernel(x_ref, sin_ref, sout_ref, scale_ref, shift_ref,
                             wmu_ref, wdelta_ref, pool_ref, o_ref,
                             *, t_d, hw, hwo):
    # x_ref:    (1, C_in,  S)    f32   S = t_d * 2 * H * W (spatial, lane dim)
    # sin_ref:  (1, C_in,  S)    bf16  (+-1)
    # sout_ref: (1, C_out, S)    bf16  (+-1)
    # scale/shift: (C_in, 1)     f32   folded eval-mode BatchNorm
    # wmu/wdelta:  (C_out, C_in) bf16  1x1x1 conv weights (mean / flipout delta)
    # pool_ref: (H*W, Hh*Wh)     bf16  0 / 0.125 H,W-pooling matrix (D pair is
    #                                  pre-summed by a slice add, so 1/8 covers
    #                                  all 8 window elements)
    # o_ref:    (1, C_out, S_out) f32  S_out = t_d * Hh * Wh
    x = x_ref[0]
    h = jnp.maximum(x * scale_ref[...] + shift_ref[...], 0.0)   # BN + ReLU (f32)

    # bf16 operands (MXU native), f32 accumulation; the +-1 flip is exact in
    # bf16 so the perturbed activation is formed directly in bf16.
    h_bf = h.astype(jnp.bfloat16)
    hp_bf = h_bf * sin_ref[0]
    y = jnp.dot(wmu_ref[...], h_bf, preferred_element_type=jnp.float32)
    y = y + sout_ref[0].astype(jnp.float32) * jnp.dot(
        wdelta_ref[...], hp_bf, preferred_element_type=jnp.float32)   # (C_out, S)

    # 2x2x2 average pool: per D-slice pair, sum the two D-halves with a
    # contiguous lane-slice add, then fold the 2x2 H,W pooling with a tiny
    # constant matrix (reused across t_d).  Static unroll over t_d.
    pool = pool_ref[...]
    for t in range(t_d):
        yc = y[:, t * 2 * hw:(t + 1) * 2 * hw]                 # (C_out, 2*H*W)
        yd = (yc[:, :hw] + yc[:, hw:]).astype(jnp.bfloat16)    # D-pair sum
        o_ref[0, :, t * hwo:(t + 1) * hwo] = jnp.dot(
            yd, pool, preferred_element_type=jnp.float32).astype(o_ref.dtype)


# ------------------------------ wrapper glue --------------------------------


def _vmem_budgets():
    """Generation-aware VMEM planning (v7x: 64 MiB/TC, v5e/v6e: 128 MiB)."""
    try:
        cap = int(pltpu.get_tpu_info().vmem_capacity_bytes)
    except Exception:
        cap = 64 << 20                       # conservative (v7x) if query fails
    tile_budget = min(int(cap * 0.40), 56 << 20)   # ~25 MiB v7x, ~51 MiB v6e
    vmem_limit = min(int(cap * 0.75), 100 << 20)   # ~48 MiB v7x, ~96 MiB v6e
    return tile_budget, vmem_limit


def _pick_t_d(N, D2, H, W, C_in, C_out, budget_bytes):
    """Number of output-D slices (2x2x2 window rows) per block.

    Legal iff the block's trailing dims are 128-multiples or span the full
    array.  Among legal tiles whose (double-buffered, constants included)
    footprint fits the budget, prefer grids with an even number of >= 4
    programs (v7x megacore balance), then >= 2, then take the largest tile."""
    hw2, hwo = 2 * H * W, (H // 2) * (W // 2)
    pad8 = lambda r: -(-r // 8) * 8
    pad128 = lambda c: -(-c // 128) * 128

    def legal(td):
        return td == D2 or (td * hw2 % 128 == 0 and td * hwo % 128 == 0)

    def nbytes(td):
        s, so = td * hw2, td * hwo
        ci, co = pad8(C_in), pad8(C_out)
        per_buf = ci * s * 4 + ci * s * 2 + co * s * 2 + co * pad128(so) * 4
        consts = (pad8(H * W) * pad128(hwo) * 2        # pool matrix (bf16)
                  + 2 * co * pad128(C_in) * 2          # conv weights (bf16)
                  + 2 * ci * 128 * 4)                  # scale / shift
        # Pallas double-buffers every BlockSpec operand, constants included.
        return 2 * per_buf + 2 * consts

    legal_tds = [td for td in range(1, D2 + 1) if D2 % td == 0 and legal(td)]
    cands = [td for td in legal_tds if td <= 64 and nbytes(td) <= budget_bytes]
    if not cands:                 # nothing fits: smallest legal tile (bounded)
        cands = legal_tds[:1]

    def steps(td):
        return N * (D2 // td)

    for pred in (lambda td: steps(td) >= 4 and steps(td) % 2 == 0,
                 lambda td: steps(td) >= 2,
                 lambda td: True):
        pool = [td for td in cands if pred(td)]
        if pool:
            return max(pool)


def _build_pool_matrix(H, W):
    """(H*W, Hh*Wh) matrix folding the 2x2 pooling over H and W; entries are
    0 or 1/8 (the D pair is pre-summed in the kernel, so 1/8 covers all 8)."""
    Hh, Wh = H // 2, W // 2
    s = np.arange(H * W)
    col = (s // W // 2) * Wh + (s % W) // 2
    P = (col[:, None] == np.arange(Hh * Wh)[None, :]).astype(np.float32) * 0.125
    return jnp.asarray(P, dtype=jnp.bfloat16)          # 0.125 exact in bf16


def transition_forward(x, params, sign_in, sign_out,
                       *, prior_mean=0.0, prior_variance=1.0, bn_eps=1e-5):
    N, C_in, D, H, W = x.shape
    # TODO(synk): PyTorch AvgPool3d(kernel=2, stride=2) floors odd spatial dims;
    # this kernel assumes even D/H/W (true for the DenseNet3D transition usage).
    assert D % 2 == 0 and H % 2 == 0 and W % 2 == 0
    mu_k = params["mu_kernel"]                          # (C_out, C_in, 1, 1, 1)
    C_out = mu_k.shape[0]
    D2, Hh, Wh = D // 2, H // 2, W // 2

    # BatchNorm (eval mode) folded into per-channel scale/shift (f32).
    inv_std = jax.lax.rsqrt(params["running_var"].astype(jnp.float32) + bn_eps)
    gamma = params["gamma"].astype(jnp.float32)
    scale = (gamma * inv_std).reshape(C_in, 1)
    shift = (params["beta"].astype(jnp.float32)
             - params["running_mean"].astype(jnp.float32) * gamma * inv_std
             ).reshape(C_in, 1)

    # 1x1x1 Flipout conv weights as (C_out, C_in): f32 master copies for the KL,
    # bf16 copies for the MXU (f32 accumulation in-kernel).
    mu2d = mu_k.reshape(C_out, C_in).astype(jnp.float32)
    sigma2d = jax.nn.softplus(
        params["rho_kernel"].reshape(C_out, C_in).astype(jnp.float32))
    w_delta = sigma2d * params["eps_kernel"].reshape(C_out, C_in).astype(jnp.float32)
    mu_bf = mu2d.astype(jnp.bfloat16)
    w_delta_bf = w_delta.astype(jnp.bfloat16)

    # Native channel-major layout, spatial flattened onto the lane dimension
    # (free reshapes -- no transposes).  Signs are exactly +-1 -> ship as bf16.
    x_f = x.astype(jnp.float32).reshape(N, C_in, D * H * W)
    sin_f = sign_in.reshape(N, C_in, D * H * W).astype(jnp.bfloat16)
    sout_f = sign_out.reshape(N, C_out, D * H * W).astype(jnp.bfloat16)

    tile_budget, vmem_limit = _vmem_budgets()
    t_d = _pick_t_d(N, D2, H, W, C_in, C_out, tile_budget)
    S = t_d * 2 * H * W                              # input lanes per block
    S_out = t_d * Hh * Wh                            # output lanes per block
    n_j = D2 // t_d
    pool_mat = _build_pool_matrix(H, W)

    kernel = functools.partial(_transition_fused_kernel,
                               t_d=t_d, hw=H * W, hwo=Hh * Wh)

    out_flat = pl.pallas_call(
        kernel,
        out_shape=jax.ShapeDtypeStruct((N, C_out, D2 * Hh * Wh), jnp.float32),
        grid=(N, n_j),
        in_specs=[
            pl.BlockSpec((1, C_in, S), lambda n, j: (n, 0, j)),     # x
            pl.BlockSpec((1, C_in, S), lambda n, j: (n, 0, j)),     # sign_in
            pl.BlockSpec((1, C_out, S), lambda n, j: (n, 0, j)),    # sign_out
            pl.BlockSpec((C_in, 1), lambda n, j: (0, 0)),           # scale
            pl.BlockSpec((C_in, 1), lambda n, j: (0, 0)),           # shift
            pl.BlockSpec((C_out, C_in), lambda n, j: (0, 0)),       # W_mu (bf16)
            pl.BlockSpec((C_out, C_in), lambda n, j: (0, 0)),       # W_delta
            pl.BlockSpec((H * W, Hh * Wh), lambda n, j: (0, 0)),    # HW pool mat
        ],
        out_specs=pl.BlockSpec((1, C_out, S_out), lambda n, j: (n, 0, j)),
        compiler_params=pltpu.CompilerParams(
            dimension_semantics=("parallel", "parallel"),
            vmem_limit_bytes=int(vmem_limit)),
    )(x_f, sin_f, sout_f, scale, shift, mu_bf, w_delta_bf, pool_mat)

    out = out_flat.reshape(N, C_out, D2, Hh, Wh)     # already NCDHW order

    # KL of the variational conv weights: C_out*C_in scalars -> plain f32 jnp
    # (a kernel launch + (1,1) HBM round-trip would cost more than the math).
    prior_sigma = jnp.float32(prior_variance)
    kl = jnp.mean(jnp.log(prior_sigma) - jnp.log(sigma2d)
                  + (sigma2d ** 2 + (mu2d - jnp.float32(prior_mean)) ** 2)
                  / (2.0 * prior_sigma ** 2) - 0.5)
    return out, kl


# ------------------------------ reference ----------------------------------


def _reference(x, params, sign_in, sign_out, *, prior_mean, prior_variance,
               bn_eps=1e-5):
    N, C_in, D, H, W = x.shape
    mu_k = params["mu_kernel"]
    C_out = mu_k.shape[0]
    g = params["gamma"][None, :, None, None, None]
    b = params["beta"][None, :, None, None, None]
    m = params["running_mean"][None, :, None, None, None]
    v = params["running_var"][None, :, None, None, None]
    h = jnp.maximum((x - m) / jnp.sqrt(v + bn_eps) * g + b, 0.0)
    mu2d = mu_k.reshape(C_out, C_in)
    sigma2d = jax.nn.softplus(params["rho_kernel"].reshape(C_out, C_in))
    delta2d = sigma2d * params["eps_kernel"].reshape(C_out, C_in)
    y = (jnp.einsum("ncdhw,oc->nodhw", h, mu2d)
         + sign_out * jnp.einsum("ncdhw,oc->nodhw", h * sign_in, delta2d))
    y = y.reshape(N, C_out, D // 2, 2, H // 2, 2, W // 2, 2).mean(axis=(3, 5, 7))
    kl = (jnp.log(prior_variance) - jnp.log(sigma2d)
          + (sigma2d ** 2 + (mu2d - prior_mean) ** 2)
          / (2.0 * prior_variance ** 2) - 0.5).mean()
    return y, kl


# -------------------------------- main --------------------------------------


if __name__ == "__main__":
    key = jax.random.PRNGKey(0)
    ks = jax.random.split(key, 10)

    N, C_in, D, H, W = 2, 8, 8, 8, 8
    C_out = C_in // 2
    prior_mean, prior_variance = 0.0, 1.0
    posterior_mu_init, posterior_rho_init = 0.0, -3.0

    x = jax.random.normal(ks[0], (N, C_in, D, H, W), jnp.float32)

    params = {
        "gamma": 1.0 + 0.1 * jax.random.normal(ks[1], (C_in,), jnp.float32),
        "beta": 0.1 * jax.random.normal(ks[2], (C_in,), jnp.float32),
        "running_mean": 0.1 * jax.random.normal(ks[3], (C_in,), jnp.float32),
        "running_var": jax.random.uniform(ks[4], (C_in,), jnp.float32, 0.5, 1.5),
        "mu_kernel": posterior_mu_init
        + 0.1 * jax.random.normal(ks[5], (C_out, C_in, 1, 1, 1), jnp.float32),
        "rho_kernel": posterior_rho_init
        + 0.1 * jax.random.normal(ks[6], (C_out, C_in, 1, 1, 1), jnp.float32),
        "eps_kernel": jax.random.normal(ks[7], (C_out, C_in, 1, 1, 1), jnp.float32),
    }
    # Flipout random sign tensors (torch: uniform(-1,1).sign()).
    sign_in = jnp.where(jax.random.uniform(ks[8], (N, C_in, D, H, W)) < 0.5,
                        -1.0, 1.0).astype(jnp.float32)
    sign_out = jnp.where(jax.random.uniform(ks[9], (N, C_out, D, H, W)) < 0.5,
                         -1.0, 1.0).astype(jnp.float32)

    fwd = jax.jit(functools.partial(transition_forward,
                                    prior_mean=prior_mean,
                                    prior_variance=prior_variance))
    out, kl = fwd(x, params, sign_in, sign_out)
    jax.block_until_ready((out, kl))

    out_ref, kl_ref = _reference(x, params, sign_in, sign_out,
                                 prior_mean=prior_mean,
                                 prior_variance=prior_variance)
    assert out.shape == (N, C_out, D // 2, H // 2, W // 2), out.shape
    # bf16 matmul operands (f32 accumulation) -> ~1e-3 relative error budget.
    assert jnp.allclose(out, out_ref, rtol=1e-2, atol=1e-2), \
        float(jnp.max(jnp.abs(out - out_ref)))
    assert jnp.allclose(kl, kl_ref, rtol=1e-5, atol=1e-6)

    print("KERNEL_OK")
</pallas_src>

<mosaic_0001>
module attributes {stable_mosaic.version = 11 : i64} {
  func.func @_transition_fused_kernel(%arg0: i32, %arg1: i32, %arg2: memref<1x8x512xf32, #tpu.memory_space<vmem>>, %arg3: memref<1x8x512xbf16, #tpu.memory_space<vmem>>, %arg4: memref<1x4x512xbf16, #tpu.memory_space<vmem>>, %arg5: memref<8x1xf32, #tpu.memory_space<vmem>>, %arg6: memref<8x1xf32, #tpu.memory_space<vmem>>, %arg7: memref<4x8xbf16, #tpu.memory_space<vmem>>, %arg8: memref<4x8xbf16, #tpu.memory_space<vmem>>, %arg9: memref<64x16xbf16, #tpu.memory_space<vmem>>, %arg10: memref<1x4x64xf32, #tpu.memory_space<vmem>>) attributes {dimension_semantics = [#tpu.dimension_semantics<parallel>, #tpu.dimension_semantics<parallel>], iteration_bounds = array<i64: 2, 1>, scalar_prefetch = 0 : i64, scratch_operands = 0 : i64, tpu.core_type = #tpu.core_type<tc>, window_params = [{transform_indices = @transform_0, window_bounds = array<i64: 1, 8, 512>}, {transform_indices = @transform_1, window_bounds = array<i64: 1, 8, 512>}, {transform_indices = @transform_2, window_bounds = array<i64: 1, 4, 512>}, {pipeline_mode = #tpu.pipeline_mode<synchronous>, transform_indices = @transform_3, window_bounds = array<i64: 8, 1>}, {pipeline_mode = #tpu.pipeline_mode<synchronous>, transform_indices = @transform_4, window_bounds = array<i64: 8, 1>}, {pipeline_mode = #tpu.pipeline_mode<synchronous>, transform_indices = @transform_5, window_bounds = array<i64: 4, 8>}, {pipeline_mode = #tpu.pipeline_mode<synchronous>, transform_indices = @transform_6, window_bounds = array<i64: 4, 8>}, {pipeline_mode = #tpu.pipeline_mode<synchronous>, transform_indices = @transform_7, window_bounds = array<i64: 64, 16>}, {transform_indices = @transform_8, window_bounds = array<i64: 1, 4, 64>}]} {
    %c0 = arith.constant 0 : index
    %c0_0 = arith.constant 0 : index
    %c0_1 = arith.constant 0 : index
    %0 = vector.load %arg2[%c0, %c0_0, %c0_1] : memref<1x8x512xf32, #tpu.memory_space<vmem>>, vector<1x8x512xf32>
    %1 = vector.shape_cast %0 : vector<1x8x512xf32> to vector<8x512xf32>
    %c0_2 = arith.constant 0 : index
    %c0_3 = arith.constant 0 : index
    %2 = vector.load %arg5[%c0_2, %c0_3] : memref<8x1xf32, #tpu.memory_space<vmem>>, vector<8x1xf32>
    %3 = vector.broadcast %2 : vector<8x1xf32> to vector<8x512xf32>
    %4 = arith.mulf %1, %3 : vector<8x512xf32>
    %c0_4 = arith.constant 0 : index
    %c0_5 = arith.constant 0 : index
    %5 = vector.load %arg6[%c0_4, %c0_5] : memref<8x1xf32, #tpu.memory_space<vmem>>, vector<8x1xf32>
    %6 = vector.broadcast %5 : vector<8x1xf32> to vector<8x512xf32>
    %7 = arith.addf %4, %6 : vector<8x512xf32>
    %cst = arith.constant 0.000000e+00 : f32
    %8 = vector.broadcast %cst : f32 to vector<8x512xf32>
    %9 = arith.maximumf %7, %8 : vector<8x512xf32>
    %10 = arith.truncf %9 : vector<8x512xf32> to vector<8x512xbf16>
    %c0_6 = arith.constant 0 : index
    %c0_7 = arith.constant 0 : index
    %c0_8 = arith.constant 0 : index
    %11 = vector.load %arg3[%c0_6, %c0_7, %c0_8] : memref<1x8x512xbf16, #tpu.memory_space<vmem>>, vector<1x8x512xbf16>
    %12 = vector.shape_cast %11 : vector<1x8x512xbf16> to vector<8x512xbf16>
    %13 = arith.mulf %10, %12 : vector<8x512xbf16>
    %c0_9 = arith.constant 0 : index
    %c0_10 = arith.constant 0 : index
    %14 = vector.load %arg7[%c0_9, %c0_10] : memref<4x8xbf16, #tpu.memory_space<vmem>>, vector<4x8xbf16>
    %cst_11 = arith.constant dense<0.000000e+00> : vector<4x512xf32>
    %15 = tpu.matmul %14, %10, %cst_11 {dimension_numbers = #tpu.dot_dimension_numbers<[1], [0], [0], [1], [0, 0, 1, 1], [], []>} : vector<4x8xbf16>, vector<8x512xbf16>, vector<4x512xf32> -> vector<4x512xf32>
    %c0_12 = arith.constant 0 : index
    %c0_13 = arith.constant 0 : index
    %c0_14 = arith.constant 0 : index
    %16 = vector.load %arg4[%c0_12, %c0_13, %c0_14] : memref<1x4x512xbf16, #tpu.memory_space<vmem>>, vector<1x4x512xbf16>
    %17 = vector.shape_cast %16 : vector<1x4x512xbf16> to vector<4x512xbf16>
    %18 = arith.extf %17 : vector<4x512xbf16> to vector<4x512xf32>
    %c0_15 = arith.constant 0 : index
    %c0_16 = arith.constant 0 : index
    %19 = vector.load %arg8[%c0_15, %c0_16] : memref<4x8xbf16, #tpu.memory_space<vmem>>, vector<4x8xbf16>
    %cst_17 = arith.constant dense<0.000000e+00> : vector<4x512xf32>
    %20 = tpu.matmul %19, %13, %cst_17 {dimension_numbers = #tpu.dot_dimension_numbers<[1], [0], [0], [1], [0, 0, 1, 1], [], []>} : vector<4x8xbf16>, vector<8x512xbf16>, vector<4x512xf32> -> vector<4x512xf32>
    %21 = arith.mulf %18, %20 : vector<4x512xf32>
    %22 = arith.addf %15, %21 : vector<4x512xf32>
    %c0_18 = arith.constant 0 : index
    %c0_19 = arith.constant 0 : index
    %23 = vector.load %arg9[%c0_18, %c0_19] : memref<64x16xbf16, #tpu.memory_space<vmem>>, vector<64x16xbf16>
    %24 = vector.extract_strided_slice %22 {offsets = [0, 0], sizes = [4, 128], strides = [1, 1]} : vector<4x512xf32> to vector<4x128xf32>
    %25 = vector.extract_strided_slice %24 {offsets = [0, 0], sizes = [4, 64], strides = [1, 1]} : vector<4x128xf32> to vector<4x64xf32>
    %26 = vector.extract_strided_slice %24 {offsets = [0, 64], sizes = [4, 64], strides = [1, 1]} : vector<4x128xf32> to vector<4x64xf32>
    %27 = arith.addf %25, %26 : vector<4x64xf32>
    %28 = arith.truncf %27 : vector<4x64xf32> to vector<4x64xbf16>
    %cst_20 = arith.constant dense<0.000000e+00> : vector<4x16xf32>
    %29 = tpu.matmul %28, %23, %cst_20 {dimension_numbers = #tpu.dot_dimension_numbers<[1], [0], [0], [1], [0, 0, 1, 1], [], []>} : vector<4x64xbf16>, vector<64x16xbf16>, vector<4x16xf32> -> vector<4x16xf32>
    %c0_21 = arith.constant 0 : index
    %c0_22 = arith.constant 0 : index
    %c0_23 = arith.constant 0 : index
    %30 = vector.load %arg10[%c0_21, %c0_22, %c0_23] : memref<1x4x64xf32, #tpu.memory_space<vmem>>, vector<1x4x16xf32>
    %31 = vector.shape_cast %30 : vector<1x4x16xf32> to vector<4x16xf32>
    %32 = vector.shape_cast %29 : vector<4x16xf32> to vector<1x4x16xf32>
    tpu.vector_store %arg10[%c0_21, %c0_22, %c0_23], %32 {strides = array<i32>} : memref<1x4x64xf32, #tpu.memory_space<vmem>>, vector<1x4x16xf32>,
    %33 = vector.extract_strided_slice %22 {offsets = [0, 128], sizes = [4, 128], strides = [1, 1]} : vector<4x512xf32> to vector<4x128xf32>
    %34 = vector.extract_strided_slice %33 {offsets = [0, 0], sizes = [4, 64], strides = [1, 1]} : vector<4x128xf32> to vector<4x64xf32>
    %35 = vector.extract_strided_slice %33 {offsets = [0, 64], sizes = [4, 64], strides = [1, 1]} : vector<4x128xf32> to vector<4x64xf32>
    %36 = arith.addf %34, %35 : vector<4x64xf32>
    %37 = arith.truncf %36 : vector<4x64xf32> to vector<4x64xbf16>
    %cst_24 = arith.constant dense<0.000000e+00> : vector<4x16xf32>
    %38 = tpu.matmul %37, %23, %cst_24 {dimension_numbers = #tpu.dot_dimension_numbers<[1], [0], [0], [1], [0, 0, 1, 1], [], []>} : vector<4x64xbf16>, vector<64x16xbf16>, vector<4x16xf32> -> vector<4x16xf32>
    %c0_25 = arith.constant 0 : index
    %c0_26 = arith.constant 0 : index
    %c16 = arith.constant 16 : index
    %39 = vector.load %arg10[%c0_25, %c0_26, %c16] : memref<1x4x64xf32, #tpu.memory_space<vmem>>, vector<1x4x16xf32>
    %40 = vector.shape_cast %39 : vector<1x4x16xf32> to vector<4x16xf32>
    %41 = vector.shape_cast %38 : vector<4x16xf32> to vector<1x4x16xf32>
    tpu.vector_store %arg10[%c0_25, %c0_26, %c16], %41 {strides = array<i32>} : memref<1x4x64xf32, #tpu.memory_space<vmem>>, vector<1x4x16xf32>,
    %42 = vector.extract_strided_slice %22 {offsets = [0, 256], sizes = [4, 128], strides = [1, 1]} : vector<4x512xf32> to vector<4x128xf32>
    %43 = vector.extract_strided_slice %42 {offsets = [0, 0], sizes = [4, 64], strides = [1, 1]} : vector<4x128xf32> to vector<4x64xf32>
    %44 = vector.extract_strided_slice %42 {offsets = [0, 64], sizes = [4, 64], strides = [1, 1]} : vector<4x128xf32> to vector<4x64xf32>
    %45 = arith.addf %43, %44 : vector<4x64xf32>
    %46 = arith.truncf %45 : vector<4x64xf32> to vector<4x64xbf16>
    %cst_27 = arith.constant dense<0.000000e+00> : vector<4x16xf32>
    %47 = tpu.matmul %46, %23, %cst_27 {dimension_numbers = #tpu.dot_dimension_numbers<[1], [0], [0], [1], [0, 0, 1, 1], [], []>} : vector<4x64xbf16>, vector<64x16xbf16>, vector<4x16xf32> -> vector<4x16xf32>
    %c0_28 = arith.constant 0 : index
    %c0_29 = arith.constant 0 : index
    %c32 = arith.constant 32 : index
    %48 = vector.load %arg10[%c0_28, %c0_29, %c32] : memref<1x4x64xf32, #tpu.memory_space<vmem>>, vector<1x4x16xf32>
    %49 = vector.shape_cast %48 : vector<1x4x16xf32> to vector<4x16xf32>
    %50 = vector.shape_cast %47 : vector<4x16xf32> to vector<1x4x16xf32>
    tpu.vector_store %arg10[%c0_28, %c0_29, %c32], %50 {strides = array<i32>} : memref<1x4x64xf32, #tpu.memory_space<vmem>>, vector<1x4x16xf32>,
    %51 = vector.extract_strided_slice %22 {offsets = [0, 384], sizes = [4, 128], strides = [1, 1]} : vector<4x512xf32> to vector<4x128xf32>
    %52 = vector.extract_strided_slice %51 {offsets = [0, 0], sizes = [4, 64], strides = [1, 1]} : vector<4x128xf32> to vector<4x64xf32>
    %53 = vector.extract_strided_slice %51 {offsets = [0, 64], sizes = [4, 64], strides = [1, 1]} : vector<4x128xf32> to vector<4x64xf32>
    %54 = arith.addf %52, %53 : vector<4x64xf32>
    %55 = arith.truncf %54 : vector<4x64xf32> to vector<4x64xbf16>
    %cst_30 = arith.constant dense<0.000000e+00> : vector<4x16xf32>
    %56 = tpu.matmul %55, %23, %cst_30 {dimension_numbers = #tpu.dot_dimension_numbers<[1], [0], [0], [1], [0, 0, 1, 1], [], []>} : vector<4x64xbf16>, vector<64x16xbf16>, vector<4x16xf32> -> vector<4x16xf32>
    %c0_31 = arith.constant 0 : index
    %c0_32 = arith.constant 0 : index
    %c48 = arith.constant 48 : index
    %57 = vector.load %arg10[%c0_31, %c0_32, %c48] : memref<1x4x64xf32, #tpu.memory_space<vmem>>, vector<1x4x16xf32>
    %58 = vector.shape_cast %57 : vector<1x4x16xf32> to vector<4x16xf32>
    %59 = vector.shape_cast %56 : vector<4x16xf32> to vector<1x4x16xf32>
    tpu.vector_store %arg10[%c0_31, %c0_32, %c48], %59 {strides = array<i32>} : memref<1x4x64xf32, #tpu.memory_space<vmem>>, vector<1x4x16xf32>,
    return
  }
  func.func @transform_0(%arg0: i32, %arg1: i32) -> (i32, i32, i32) {
    %c0_i32 = arith.constant 0 : i32
    %c0_i32_0 = arith.constant 0 : i32
    return %arg0, %c0_i32, %arg1 : i32, i32, i32
  }
  func.func @transform_1(%arg0: i32, %arg1: i32) -> (i32, i32, i32) {
    %c0_i32 = arith.constant 0 : i32
    %c0_i32_0 = arith.constant 0 : i32
    return %arg0, %c0_i32, %arg1 : i32, i32, i32
  }
  func.func @transform_2(%arg0: i32, %arg1: i32) -> (i32, i32, i32) {
    %c0_i32 = arith.constant 0 : i32
    %c0_i32_0 = arith.constant 0 : i32
    return %arg0, %c0_i32, %arg1 : i32, i32, i32
  }
  func.func @transform_3(%arg0: i32, %arg1: i32) -> (i32, i32) {
    %c0_i32 = arith.constant 0 : i32
    %c0_i32_0 = arith.constant 0 : i32
    %c0_i32_1 = arith.constant 0 : i32
    return %c0_i32, %c0_i32_0 : i32, i32
  }
  func.func @transform_4(%arg0: i32, %arg1: i32) -> (i32, i32) {
    %c0_i32 = arith.constant 0 : i32
    %c0_i32_0 = arith.constant 0 : i32
    %c0_i32_1 = arith.constant 0 : i32
    return %c0_i32, %c0_i32_0 : i32, i32
  }
  func.func @transform_5(%arg0: i32, %arg1: i32) -> (i32, i32) {
    %c0_i32 = arith.constant 0 : i32
    %c0_i32_0 = arith.constant 0 : i32
    %c0_i32_1 = arith.constant 0 : i32
    return %c0_i32, %c0_i32_0 : i32, i32
  }
  func.func @transform_6(%arg0: i32, %arg1: i32) -> (i32, i32) {
    %c0_i32 = arith.constant 0 : i32
    %c0_i32_0 = arith.constant 0 : i32
    %c0_i32_1 = arith.constant 0 : i32
    return %c0_i32, %c0_i32_0 : i32, i32
  }
  func.func @transform_7(%arg0: i32, %arg1: i32) -> (i32, i32) {
    %c0_i32 = arith.constant 0 : i32
    %c0_i32_0 = arith.constant 0 : i32
    %c0_i32_1 = arith.constant 0 : i32
    return %c0_i32, %c0_i32_0 : i32, i32
  }
  func.func @transform_8(%arg0: i32, %arg1: i32) -> (i32, i32, i32) {
    %c0_i32 = arith.constant 0 : i32
    %c0_i32_0 = arith.constant 0 : i32
    return %arg0, %c0_i32, %arg1 : i32, i32, i32
  }
}

</mosaic_0001>

<bundles_post_ra>
// kernel: transition_forward.1
= control target key start
LH: loop header
LB: loop body
LE: loop exit
PB: predicated region body
PF: predicated region fallthrough
CT: control target
= control target key end

     0   :  { %s1265_s27 = smov 0   ;;  %s1267_s28 = smov 0   ;;  %s1392_s0 = inlined_call_operand.vmem [shape: f32[2,8,512], index: 0, kind: input, shape index: {}]   ;;  %s1393_s1 = inlined_call_operand.vmem [shape: bf16[2,8,512], index: 1, kind: input, shape index: {}]   ;;  %s1394_s2 = inlined_call_operand.vmem [shape: bf16[2,4,512], index: 2, kind: input, shape index: {}]   ;;  %s1395_s3 = inlined_call_operand.vmem [shape: f32[8,1], index: 3, kind: input, shape index: {}]   ;;  %s1396_s4 = inlined_call_operand.vmem [shape: f32[8,1], index: 4, kind: input, shape index: {}]   ;;  %s1397_s5 = inlined_call_operand.vmem [shape: bf16[4,8], index: 5, kind: input, shape index: {}]   ;;  %s1398_s6 = inlined_call_operand.vmem [shape: bf16[4,8], index: 6, kind: input, shape index: {}]   ;;  %s1399_s7 = inlined_call_operand.vmem [shape: bf16[64,16], index: 7, kind: input, shape index: {}]   ;;  %s1400_s8 = inlined_call_operand.vmem [shape: f32[2,4,64], index: 8, kind: output, shape index: {}]  }
   0x1   :  { %s1269_s29 = smov 0  }
   0x2 LB: > { %s30_s30 = sadd.s32 1, %s1207_s28  ;;  %p1048_p0 = scmp.ge.s32.totalorder %s1211_s29, 1  ;;  %s1211_s29 = sphi %s1269_s29, %s18_s29   ;;  %s1207_s28 = sphi %s1267_s28, %s1402_s28   ;;  %s1203_s27 = sphi %s1265_s27, %s1401_s27  }
   0x3   : > { %p32_p1 = scmp.ge.s32.totalorder %s30_s30, 2  ;;  %p317_p2 = scmp.lt.s32.totalorder %s1211_s29, 3 }
   0x5   : > { %s1404_s30 = smov (%p32_p1, %s30_s30), 0  ;;  %p318_p3 = pnand %p1048_p0, %p317_p2 }
   0x6   : > { %v417_v0 = vld [vmem:[%s1395_s3] sm:$0xff] (!%p318_p3)  ;;  %v1213_v1 = vmov (!%p318_p3), 0   ;;  %p376_p4 = scmp.lt.s32.totalorder (!%p318_p3), %s1203_s27, 1  ;;  %vm474_vm0 = vcmask (!%p318_p3), 1043456   ;;  %vm470_vm1 = vcmask (!%p318_p3), 64512   ;;  %v1214_v42 = vmov (!%p318_p3), 0.0  }
   0x7   : > { %321 = sbr.rel (%p318_p3) target bundleno = 841 (0x349), region = 52  ;;  %1180 = vset.pattern.permute.xlu0 (!%p318_p3), %v1213_v1  ;;  %519 = vmatprep.mubr.bf16.mxu0 (!%p318_p3), %v1213_v1  ;;  %v427_v2 = vld [vmem:[%s1396_s4] sm:$0xff] (!%p318_p3)  ;;  %v1316_v43 = vld [vmem:[%s1399_s7 + $0x8] sm:$0xff] (!%p318_p3)   ;;  %v1325_v44 = vld [vmem:[%s1399_s7 + $0x10] sm:$0xff] (!%p318_p3)   ;;  %vm1215_vm2 = vmmov (!%p318_p3), 0   ;;  %s1216_s19 = smov (!%p318_p3), 64  }
   0x8   : > { %420 = vperm.xlu0 (!%p318_p3), %1180, %v417_v0   ;;  %560 = vmatprep.mubr.bf16.mxu1 (!%p318_p3), %v1213_v1  ;;  %v469_v37 = vld [vmem:[%s1398_s6] sm:$0x3] (!%p318_p3)  ;;  %v1341_v46 = vld [vmem:[%s1399_s7 + $0x18] sm:$0xff] (!%p318_p3)   ;;  %vm720_vm3 = vcmask (!%p318_p3), 523264   ;;  %vm764_vm4 = vcmask (!%p318_p3), 125952   ;;  %s1217_s24 = smov (!%p318_p3), 16  }
   0x9   : > { %v465_v40 = vld [vmem:[%s1397_s5] sm:$0x3] (!%p318_p3)  ;;  %s1219_s25 = smov (!%p318_p3), 48   ;;  %vm819_vm5 = vcmask (!%p318_p3), 257152   ;;  %vm874_vm6 = vcmask (!%p318_p3), 388352   ;;  %vm929_vm7 = vcmask (!%p318_p3), 519552  }
   0xa   : > { %v1308_v41 = vld [vmem:[%s1399_s7] sm:$0xff] (!%p318_p3)  }
   0xc   : > { %430 = vperm.xlu0 (!%p318_p3), %1180, %v427_v2  }
   0xe   : > { %s1406_s27 = smov (!%p376_p4, %s1203_s27), 1 }
   0xf   : > { %s1078_s13 = sshll.u32 %s1406_s27, 5  ;;  %s1079_s17 = sshll.u32 %s1406_s27, 4 }
  0x10   : > { %s383_s16 = scalar_lea.vmem %s1392_s0, %s1078_s13  ;;  %s393_s20 = scalar_lea.vmem %s1393_s1, %s1079_s17 }
  0x11   : > { %v413_v3 = vld [vmem:[%s383_s16] sm:$0xff]  ;;  %v414_v5 = vld [vmem:[%s383_s16 + $0x8] sm:$0xff]  ;;  %v415_v6 = vld [vmem:[%s383_s16 + $0x10] sm:$0xff]  ;;  %s1080_s13 = sshll.u32 %s1406_s27, 3 }
  0x12   : > { %v416_v7 = vld [vmem:[%s383_s16 + $0x18] sm:$0xff]  ;;  %v445_v12 = vld [vmem:[%s393_s20] sm:$0xff]  ;;  %v446_v13 = vld [vmem:[%s393_s20 + $0x8] sm:$0xff]  ;;  %s403_s16 = scalar_lea.vmem %s1394_s2, %s1080_s13  ;;  %s1055_s20 = sshll.u32 %s1406_s27, 2 }
  0x13   : > { %v1057_v19 = vcombine.high %v445_v12, %v445_v12  ;;  %v1059_v20 = vcombine.high %v446_v13, %v446_v13  ;;  %v1056_v21 = vcombine.low %v445_v12, %v445_v12  ;;  %v1058_v22 = vcombine.low %v446_v13, %v446_v13  ;;  %v466_v45 = vld [vmem:[%s403_s16] sm:$0xff]  ;;  %s1377_s23 = scalar_lea.vmem %s1400_s8, %s1055_s20  ;;  %s1218_s27 = smov 32  }
  0x14   : > { %v467_v49 = vunpack.c.l.bf16 %v466_v45  ;;  %v468_v50 = vunpack.c.h.bf16 %v466_v45 }
  0x87   : > { %v421_v4 = vpop.permute.xlu0 %420 }
  0x88   : > { %v423_v8 = vmul.f32 %v421_v4, %v413_v3  ;;  %v424_v9 = vmul.f32 %v421_v4, %v414_v5  ;;  %v425_v10 = vmul.f32 %v421_v4, %v415_v6  ;;  %v426_v11 = vmul.f32 %v421_v4, %v416_v7 }
  0x8b   : > { %v431_v14 = vpop.permute.xlu0 %430 }
  0x8c   : > { %v434_v15 = vadd.f32 %v431_v14, %v424_v9  ;;  %v436_v16 = vadd.f32 %v431_v14, %v426_v11  ;;  %v433_v17 = vadd.f32 %v431_v14, %v423_v8  ;;  %v435_v18 = vadd.f32 %v431_v14, %v425_v10 }
  0x8e   : > { %v438_v23 = vmax.f32 %v434_v15, 0.0  ;;  %v440_v24 = vmax.f32 %v436_v16, 0.0  ;;  %v437_v25 = vmax.f32 %v433_v17, 0.0  ;;  %v439_v26 = vmax.f32 %v435_v18, 0.0 }
  0x90   : > { %v442_v27 = vpack.c.bf16 %v438_v23, %v438_v23  ;;  %v444_v28 = vpack.c.bf16 %v440_v24, %v440_v24  ;;  %v441_v29 = vpack.c.bf16 %v437_v25, %v437_v25  ;;  %v443_v30 = vpack.c.bf16 %v439_v26, %v439_v26 }
  0x92   : > { %v462_v31 = vmul.bf16 %v1057_v19, %v442_v27  ;;  %v464_v32 = vmul.bf16 %v1059_v20, %v444_v28  ;;  %v461_v33 = vmul.bf16 %v1056_v21, %v441_v29  ;;  %v463_v34 = vmul.bf16 %v1058_v22, %v443_v30 }
  0x93   : > { %v589_v38 = vsel %vm474_vm0, %v441_v29, 0  ;;  %v595_v39 = vsel %vm474_vm0, %v443_v30, 0 }
  0x94   : > { %1060 = vmatprep.subr.msk.bf16.mxu0 %vm474_vm0, %v462_v31  ;;  %1062 = vmatprep.subr.msk.bf16.mxu1 %vm474_vm0, %v464_v32  ;;  %v476_v35 = vsel %vm474_vm0, %v461_v33, 0  ;;  %v482_v36 = vsel %vm474_vm0, %v463_v34, 0 }
  0x95   : > { %488 = vmatpush1.bf16.msra.mxu0 %v476_v35  ;;  %529 = vmatpush1.bf16.msra.mxu1 %v482_v36 }
  0x96   : > { %1064 = vmatprep.subr.msk.bf16.mxu0 %vm474_vm0, %v442_v27  ;;  %1066 = vmatprep.subr.msk.bf16.mxu1 %vm474_vm0, %v444_v28 }
  0x98   : > { %1061 = vmatmul.mubr.msk.bf16.vlgmr.msra.gmra.mrb[0].mxu0 %vm470_vm1, %v469_v37  ;;  %1063 = vmatmul.mubr.msk.bf16.vlgmr.msra.gmra.mrb[0].mxu1 %vm470_vm1, %v469_v37 }
  0x99   : > { %601 = vmatpush1.bf16.msra.mxu0 %v589_v38  ;;  %642 = vmatpush1.bf16.msra.mxu1 %v595_v39 }
  0x9a   : > { %632 = vmatprep.mubr.bf16.mxu0 %v1213_v1  ;;  %673 = vmatprep.mubr.bf16.mxu1 %v1213_v1 }
  0x9b   : > { %1101 = vmatprep.subr.bf16.mxu0 %v1214_v42  ;;  %1113 = vmatprep.subr.bf16.mxu1 %v1214_v42 }
  0xa0   : > { %1065 = vmatmul.mubr.msk.bf16.vlgmr.msra.gmra.mrb[4].mxu0 %vm470_vm1, %v465_v40  ;;  %1067 = vmatmul.mubr.msk.bf16.vlgmr.msra.gmra.mrb[4].mxu1 %vm470_vm1, %v465_v40 }
  0xa1   : > { %1102 = vmatpush3.bf16.msra.mxu0 %v1308_v41  ;;  %1114 = vmatpush3.bf16.msra.mxu1 %v1308_v41 }
  0xa2   : > { %1103 = vmatprep.subr.bf16.mxu0 %v1214_v42  ;;  %1115 = vmatprep.subr.bf16.mxu1 %v1214_v42 }
  0xa3   : > { %1109 = vmatprep.mubr.msk.bf16.mxu0 %vm1215_vm2, %v1214_v42  ;;  %1121 = vmatprep.mubr.msk.bf16.mxu1 %vm1215_vm2, %v1214_v42 }
  0xa5   : > { %1104 = vmatpush3.bf16.msra.mxu0 %v1316_v43  ;;  %1116 = vmatpush3.bf16.msra.mxu1 %v1316_v43 }
  0xa6   : > { %1105 = vmatprep.subr.bf16.mxu0 %v1214_v42  ;;  %1117 = vmatprep.subr.bf16.mxu1 %v1214_v42 }
  0xa9   : > { %1106 = vmatpush3.bf16.msra.mxu0 %v1325_v44  ;;  %1118 = vmatpush3.bf16.msra.mxu1 %v1325_v44 }
  0xaa   : > { %1107 = vmatprep.subr.bf16.mxu0 %v1214_v42  ;;  %1119 = vmatprep.subr.bf16.mxu1 %v1214_v42 }
  0xad   : > { %1108 = vmatpush3.bf16.msra.mxu0 %v1341_v46  ;;  %1120 = vmatpush3.bf16.msra.mxu1 %v1341_v46 }
  0xae   : > { %1125 = vmatprep.subr.bf16.mxu0 %v1214_v42  ;;  %1137 = vmatprep.subr.bf16.mxu1 %v1214_v42 }
 0x16b   : > { %v521_v47 = vpop.f32.mrb[0].mxu0  ;;  %v562_v48 = vpop.f32.mrb[0].mxu1 }
 0x16c   : > { %v523_v51 = vpop.f32.mrb[1].mxu0  ;;  %v564_v52 = vpop.f32.mrb[1].mxu1 }
 0x16d   : > { %v573_v53 = vcombine.low %v521_v47, %v523_v51  ;;  %v525_v54 = vpop.f32.mrb[2].mxu0  ;;  %v574_v55 = vcombine.low %v562_v48, %v564_v52  ;;  %v566_v56 = vpop.f32.mrb[2].mxu1 }
 0x16e   : > { %v526_v57 = vpop.f32.mrb[3].mxu0  ;;  %v567_v58 = vpop.f32.mrb[3].mxu1 }
 0x16f   : > { %v577_v59 = vmul.f32 %v573_v53, %v467_v49  ;;  %v578_v60 = vmul.f32 %v574_v55, %v468_v50 }
 0x171   : > { %v582_v61 = vcombine.high %v578_v60, %v578_v60  ;;  %v581_v0 = vcombine.high %v577_v59, %v577_v59 }
 0x173   : > { %v634_v62 = vpop.f32.mrb[4].mxu0  ;;  %v675_v63 = vpop.f32.mrb[4].mxu1 }
 0x174   : > { %v635_v1 = vadd.f32 %v634_v62, %v577_v59  ;;  %v676_v2 = vadd.f32 %v675_v63, %v578_v60  ;;  %v636_v3 = vpop.f32.mrb[5].mxu0  ;;  %v677_v4 = vpop.f32.mrb[5].mxu1 }
 0x175   : > { %v637_v5 = vadd.f32 %v636_v3, %v581_v0  ;;  %v638_v6 = vpop.f32.mrb[6].mxu0  ;;  %v678_v7 = vadd.f32 %v677_v4, %v582_v61  ;;  %v679_v8 = vpop.f32.mrb[6].mxu1 }
 0x176   : > { %822 = vrot.lane.b32.xlu0 %v676_v2, %s1216_s19  ;;  %v639_v9 = vpop.f32.mrb[7].mxu0  ;;  %691 = vrot.lane.b32.xlu1 %v635_v1, %s1216_s19  ;;  %v680_v10 = vpop.f32.mrb[7].mxu1 }
 0x17a   : > { %767 = vrot.lane.b32.xlu1 %v637_v5, %s1216_s19 }
 0x17e   : > { %877 = vrot.lane.b32.xlu1 %v678_v7, %s1216_s19 }
 0x1e8   : > { %v692_v11 = vpop.permute.xlu1 %691  ;;  %v823_v17 = vpop.permute.xlu0 %822 }
 0x1e9   : > { %v694_v12 = vadd.f32 %v692_v11, %v635_v1  ;;  %v825_v18 = vadd.f32 %v823_v17, %v676_v2 }
 0x1eb   : > { %v695_v13 = vpack.c.bf16 %v694_v12, %v694_v12  ;;  %v826_v20 = vpack.c.bf16 %v825_v18, %v825_v18 }
 0x1ec   : > { %v768_v14 = vpop.permute.xlu1 %767 }
 0x1ed   : > { %v770_v15 = vadd.f32 %v768_v14, %v637_v5  ;;  %1110 = vmatmul.mubr.msk.bf16.vlgmr.msra.gmra.mrb[8].mxu0 %vm720_vm3, %v695_v13 }
 0x1ee   : > { %1126 = vmatpush3.bf16.msra.mxu0 %v1308_v41  ;;  %1133 = vmatprep.mubr.msk.bf16.mxu0 %vm1215_vm2, %v1214_v42 }
 0x1ef   : > { %v771_v16 = vpack.c.bf16 %v770_v15, %v770_v15  ;;  %1127 = vmatprep.subr.bf16.mxu0 %v1214_v42 }
 0x1f0   : > { %v878_v19 = vpop.permute.xlu1 %877 }
 0x1f1   : > { %1122 = vmatmul.mubr.msk.bf16.vlgmr.msra.gmra.mrb[8].mxu1 %vm720_vm3, %v771_v16  ;;  %v880_v21 = vadd.f32 %v878_v19, %v678_v7 }
 0x1f2   : > { %1128 = vmatpush3.bf16.msra.mxu0 %v1316_v43  ;;  %1138 = vmatpush3.bf16.msra.mxu1 %v1308_v41 }
 0x1f3   : > { %1129 = vmatprep.subr.bf16.mxu0 %v1214_v42  ;;  %1139 = vmatprep.subr.bf16.mxu1 %v1214_v42  ;;  %v881_v22 = vpack.c.bf16 %v880_v21, %v880_v21 }
 0x1f4   : > { %1145 = vmatprep.mubr.msk.bf16.mxu1 %vm1215_vm2, %v1214_v42 }
 0x1f6   : > { %1130 = vmatpush3.bf16.msra.mxu0 %v1325_v44  ;;  %1140 = vmatpush3.bf16.msra.mxu1 %v1316_v43 }
 0x1f7   : > { %1131 = vmatprep.subr.bf16.mxu0 %v1214_v42  ;;  %1141 = vmatprep.subr.bf16.mxu1 %v1214_v42 }
 0x1fa   : > { %1132 = vmatpush3.bf16.msra.mxu0 %v1341_v46  ;;  %1142 = vmatpush3.bf16.msra.mxu1 %v1325_v44 }
 0x1fb   : > { %1143 = vmatprep.subr.bf16.mxu1 %v1214_v42 }
 0x1fd   : > { %1134 = vmatmul.mubr.msk.bf16.vlgmr.msra.gmra.mrb[12].mxu0 %vm720_vm3, %v826_v20 }
 0x1fe   : > { %1144 = vmatpush3.bf16.msra.mxu1 %v1341_v46 }
 0x201   : > { %1146 = vmatmul.mubr.msk.bf16.vlgmr.msra.gmra.mrb[12].mxu1 %vm720_vm3, %v881_v22 }
 0x2c0   : > { %v758_v23 = vpop.f32.mrb[8].mxu0 }
 0x2c1   : > { %765 = vst.msk [vmem:[%s1377_s23] sm:$0xf] %vm764_vm4, %v758_v23  ;;  %v1111_v24 = vpop.f32.mrb[9].mxu0 }
 0x2c2   : > { %v761_v25 = vpop.f32.mrb[10].mxu0 }
 0x2c3   : > { %v1112_v26 = vpop.f32.mrb[11].mxu0 }
 0x2c4   : > { %v809_v27 = vpop.f32.mrb[8].mxu1 }
 0x2c5   : > { %816 = vrot.lane.b32.xlu0 %v809_v27, %s1217_s24  ;;  %v1123_v28 = vpop.f32.mrb[9].mxu1 }
 0x2c6   : > { %v812_v29 = vpop.f32.mrb[10].mxu1 }
 0x2c7   : > { %v1124_v30 = vpop.f32.mrb[11].mxu1 }
 0x2d0   : > { %v864_v31 = vpop.f32.mrb[12].mxu0 }
 0x2d1   : > { %871 = vrot.lane.b32.xlu1 %v864_v31, %s1218_s27  ;;  %v1135_v32 = vpop.f32.mrb[13].mxu0 }
 0x2d2   : > { %v867_v33 = vpop.f32.mrb[14].mxu0 }
 0x2d3   : > { %v1136_v34 = vpop.f32.mrb[15].mxu0 }
 0x2d4   : > { %v919_v35 = vpop.f32.mrb[12].mxu1 }
 0x2d5   : > { %926 = vrot.lane.b32.xlu0 %v919_v35, %s1219_s25  ;;  %v1147_v36 = vpop.f32.mrb[13].mxu1 }
 0x2d6   : > { %v922_v37 = vpop.f32.mrb[14].mxu1 }
 0x2d7   : > { %v1148_v38 = vpop.f32.mrb[15].mxu1 }
 0x337   : > { %v817_v39 = vpop.permute.xlu0 %816 }
 0x338   : > { %820 = vst.msk [vmem:[%s1377_s23] sm:$0xf] %vm819_vm5, %v817_v39 }
 0x343   : > { %v872_v40 = vpop.permute.xlu1 %871 }
 0x344   : > { %875 = vst.msk [vmem:[%s1377_s23] sm:$0xf] %vm874_vm6, %v872_v40 }
 0x347   : > { %v927_v41 = vpop.permute.xlu0 %926 }
 0x348   : > { %930 = vst.msk [vmem:[%s1377_s23] sm:$0xf] %vm929_vm7, %v927_v41 }
 0x349 PF: > { %s18_s29 = sadd.s32 1, %s1211_s29   ;;  %s1401_s27 = smov %s1207_s28 }
 0x34a   : > { %p15_p5 = scmp.ge.s32.totalorder %s18_s29, 4   ;;  %s1402_s28 = smov %s1404_s30 }
 0x34c   :  { %17 = sbr.rel (!%p15_p5) target bundleno = 2 (0x2), region = 88 }

</bundles_post_ra>
